<compile_context>
chip_gen: v7x
topology: tpu7x:2x2x1
jax: 0.10.0
libtpu: 0.0.40
codegen_flags: <defaults>
</compile_context>

<pallas_src>
import jax
import jax.numpy as jnp
from jax.experimental import pallas as pl
from jax.experimental.pallas import tpu as pltpu

HIDDEN = 256


def _round_up(x, m):
    return ((x + m - 1) // m) * m


def _sq_forward_kernel(sa_ref, w1_ref, b1_ref, w2_ref, b2_ref, w3_ref, b3_ref, q_ref):
    # Layer 1: single merged matmul [TB, S+A] @ [S+A, H], bf16 in / f32 acc (MXU).
    h = jnp.dot(sa_ref[...], w1_ref[...], preferred_element_type=jnp.float32)
    # Fused bias + ReLU in f32 (VPU; v5e has no bf16 VALU), cast fused for layer-2 input.
    h = jnp.maximum(h + b1_ref[...], 0.0).astype(jnp.bfloat16)

    # Layer 2: [TB, 256] @ [256, 256], bf16 in / f32 acc (MXU).
    h = jnp.dot(h, w2_ref[...], preferred_element_type=jnp.float32)
    h = jnp.maximum(h + b2_ref[...], 0.0)

    # Layer 3: N=1 output -> per-lane multiply + cross-lane reduce (VPU/XLU),
    # keeping the MXU free of a nearly-empty [TB,256]@[256,1] pass.
    q = jnp.sum(h * w3_ref[...], axis=-1, keepdims=True) + b3_ref[...]
    q_ref[...] = q.astype(q_ref.dtype)


def sq_forward(state, action, params, *, block_batch=2048):
    """Pallas implementation of SQ.forward(state, action) -> [B, 1] (float32)."""
    B, S = state.shape
    A = action.shape[1]
    H = HIDDEN
    SA = S + A

    # Batch tile: multiple of 8 (sublane), capped by block_batch, and capped at
    # ceil(Bp/2) so large batches give >= 2 grid steps (both TCs busy on v7x).
    Bp0 = _round_up(max(B, 1), 8)
    TB = min(_round_up(block_batch, 8), _round_up(-(-Bp0 // 2), 8), Bp0)
    TB = max(TB, 8)
    Bp = _round_up(B, TB)
    pad = Bp - B

    # Wrapper-side concat (XLA fuses it); padded rows are zeros, sliced off at the end.
    sa = jnp.concatenate([state, action], axis=1).astype(jnp.bfloat16)
    sa = jnp.pad(sa, ((0, pad), (0, 0)))

    w1 = params["w1"].astype(jnp.bfloat16)      # [S+A, H]
    w2 = params["w2"].astype(jnp.bfloat16)      # [H, H]
    b1 = params["b1"].astype(jnp.float32)       # [1, H]
    b2 = params["b2"].astype(jnp.float32)       # [1, H]
    w3 = params["w3"].astype(jnp.float32)       # [1, H]   (row vector of l3.weight)
    b3 = params["b3"].astype(jnp.float32)       # [1, 1]

    flops = 2 * Bp * (SA * H + H * H + H)
    bytes_accessed = (
        Bp * SA * 2 + Bp * 1 * 4                       # activations in / q out
        + (SA * H + H * H) * 2 + (3 * H + 1) * 4        # weights + biases + w3/b3
    )

    out = pl.pallas_call(
        _sq_forward_kernel,
        out_shape=jax.ShapeDtypeStruct((Bp, 1), jnp.float32),
        grid=(Bp // TB,),
        in_specs=[
            pl.BlockSpec((TB, SA), lambda i: (i, 0)),   # [state|action] tile (streamed)
            pl.BlockSpec((SA, H), lambda i: (0, 0)),    # weights/biases: constant index_map
            pl.BlockSpec((1, H), lambda i: (0, 0)),     #  -> DMA'd once, VMEM-resident
            pl.BlockSpec((H, H), lambda i: (0, 0)),
            pl.BlockSpec((1, H), lambda i: (0, 0)),
            pl.BlockSpec((1, H), lambda i: (0, 0)),
            pl.BlockSpec((1, 1), lambda i: (0, 0)),
        ],
        out_specs=pl.BlockSpec((TB, 1), lambda i: (i, 0)),
        compiler_params=pltpu.CompilerParams(
            dimension_semantics=("parallel",),
            vmem_limit_bytes=32 * 1024 * 1024,
        ),
        cost_estimate=pl.CostEstimate(
            flops=flops, transcendentals=0, bytes_accessed=bytes_accessed),
    )(sa, w1, b1, w2, b2, w3, b3)

    return out[:B]


def init_sq_params(key, state_dim, action_dim, hidden=HIDDEN, init_w=0.003):
    """Init mirroring nn.Linear defaults + l3 uniform(-init_w, init_w).

    Weights are stored pre-transposed to [in_features, out_features]; layer 1's
    weight is the single merged [state_dim + action_dim, hidden] matrix.
    """
    in_dim = state_dim + action_dim
    k1, k2, k3, k4, k5, k6 = jax.random.split(key, 6)

    def linear_init(kw, kb, fan_in, fan_out):
        bound = 1.0 / jnp.sqrt(jnp.float32(fan_in))
        w = jax.random.uniform(kw, (fan_in, fan_out), jnp.float32, -bound, bound)
        b = jax.random.uniform(kb, (1, fan_out), jnp.float32, -bound, bound)
        return w, b

    w1, b1 = linear_init(k1, k2, in_dim, hidden)
    w2, b2 = linear_init(k3, k4, hidden, hidden)
    w3 = jax.random.uniform(k5, (1, hidden), jnp.float32, -init_w, init_w)
    b3 = jax.random.uniform(k6, (1, 1), jnp.float32, -init_w, init_w)

    return {
        "w1": w1.astype(jnp.bfloat16),
        "b1": b1,
        "w2": w2.astype(jnp.bfloat16),
        "b2": b2,
        "w3": w3,
        "b3": b3,
    }


def sq_forward_ref(state, action, p):
    """Pure-JAX reference mirroring the kernel's bf16-operand / f32-accum math."""
    f32 = jnp.float32
    sa = jnp.concatenate([state, action], axis=1).astype(jnp.bfloat16)
    h = jnp.dot(sa, p["w1"].astype(jnp.bfloat16), preferred_element_type=f32)
    h = jnp.maximum(h + p["b1"].astype(f32), 0.0).astype(jnp.bfloat16)
    h = jnp.dot(h, p["w2"].astype(jnp.bfloat16), preferred_element_type=f32)
    h = jnp.maximum(h + p["b2"].astype(f32), 0.0)
    return jnp.sum(h * p["w3"].astype(f32), axis=-1, keepdims=True) + p["b3"].astype(f32)


if __name__ == "__main__":
    # Small shapes consistent with the module: batch=8, state_dim=8, action_dim=4.
    batch, state_dim, action_dim = 8, 8, 4

    key = jax.random.PRNGKey(0)
    k_state, k_action, k_params = jax.random.split(key, 3)

    state = jax.random.normal(k_state, (batch, state_dim), jnp.float32)
    action = jax.random.normal(k_action, (batch, action_dim), jnp.float32)
    params = init_sq_params(k_params, state_dim, action_dim)

    q = jax.block_until_ready(sq_forward(state, action, params))
    q_ref = sq_forward_ref(state, action, params)
    assert q.shape == (batch, 1), q.shape
    assert jnp.allclose(q, q_ref, atol=1e-3, rtol=1e-3), "mismatch vs JAX reference (small batch)"

    # Second check: ragged batch with a multi-tile grid (exercises padding + pipelining
    # + the >=2-grid-steps tile cap).
    batch2 = 300
    k_s2, k_a2 = jax.random.split(jax.random.PRNGKey(1), 2)
    state2 = jax.random.normal(k_s2, (batch2, state_dim), jnp.float32)
    action2 = jax.random.normal(k_a2, (batch2, action_dim), jnp.float32)
    q2 = jax.block_until_ready(sq_forward(state2, action2, params, block_batch=128))
    q2_ref = sq_forward_ref(state2, action2, params)
    assert q2.shape == (batch2, 1), q2.shape
    assert jnp.allclose(q2, q2_ref, atol=1e-3, rtol=1e-3), "mismatch vs JAX reference (tiled batch)"

    print("KERNEL_OK")
</pallas_src>

<mosaic_0001>
module attributes {stable_mosaic.version = 11 : i64} {
  func.func @_sq_forward_kernel(%arg0: i32, %arg1: memref<8x12xbf16, #tpu.memory_space<vmem>>, %arg2: memref<12x256xbf16, #tpu.memory_space<vmem>>, %arg3: memref<1x256xf32, #tpu.memory_space<vmem>>, %arg4: memref<256x256xbf16, #tpu.memory_space<vmem>>, %arg5: memref<1x256xf32, #tpu.memory_space<vmem>>, %arg6: memref<1x256xf32, #tpu.memory_space<vmem>>, %arg7: memref<1x1xf32, #tpu.memory_space<vmem>>, %arg8: memref<8x1xf32, #tpu.memory_space<vmem>>) attributes {dimension_semantics = [#tpu.dimension_semantics<parallel>], iteration_bounds = array<i64: 1>, scalar_prefetch = 0 : i64, scratch_operands = 0 : i64, tpu.core_type = #tpu.core_type<tc>, window_params = [{transform_indices = @transform_0, window_bounds = array<i64: 8, 12>}, {pipeline_mode = #tpu.pipeline_mode<synchronous>, transform_indices = @transform_1, window_bounds = array<i64: 12, 256>}, {pipeline_mode = #tpu.pipeline_mode<synchronous>, transform_indices = @transform_2, window_bounds = array<i64: 1, 256>}, {pipeline_mode = #tpu.pipeline_mode<synchronous>, transform_indices = @transform_3, window_bounds = array<i64: 256, 256>}, {pipeline_mode = #tpu.pipeline_mode<synchronous>, transform_indices = @transform_4, window_bounds = array<i64: 1, 256>}, {pipeline_mode = #tpu.pipeline_mode<synchronous>, transform_indices = @transform_5, window_bounds = array<i64: 1, 256>}, {pipeline_mode = #tpu.pipeline_mode<synchronous>, transform_indices = @transform_6, window_bounds = array<i64: 1, 1>}, {transform_indices = @transform_7, window_bounds = array<i64: 8, 1>}]} {
    %c0 = arith.constant 0 : index
    %c0_0 = arith.constant 0 : index
    %0 = vector.load %arg1[%c0, %c0_0] : memref<8x12xbf16, #tpu.memory_space<vmem>>, vector<8x12xbf16>
    %c0_1 = arith.constant 0 : index
    %c0_2 = arith.constant 0 : index
    %1 = vector.load %arg2[%c0_1, %c0_2] : memref<12x256xbf16, #tpu.memory_space<vmem>>, vector<12x256xbf16>
    %cst = arith.constant dense<0.000000e+00> : vector<8x256xf32>
    %2 = tpu.matmul %0, %1, %cst {dimension_numbers = #tpu.dot_dimension_numbers<[1], [0], [0], [1], [0, 0, 1, 1], [], []>} : vector<8x12xbf16>, vector<12x256xbf16>, vector<8x256xf32> -> vector<8x256xf32>
    %c0_3 = arith.constant 0 : index
    %c0_4 = arith.constant 0 : index
    %3 = vector.load %arg3[%c0_3, %c0_4] : memref<1x256xf32, #tpu.memory_space<vmem>>, vector<1x256xf32>
    %4 = vector.broadcast %3 : vector<1x256xf32> to vector<8x256xf32>
    %5 = arith.addf %2, %4 : vector<8x256xf32>
    %cst_5 = arith.constant 0.000000e+00 : f32
    %6 = vector.broadcast %cst_5 : f32 to vector<8x256xf32>
    %7 = arith.maximumf %5, %6 : vector<8x256xf32>
    %8 = arith.truncf %7 : vector<8x256xf32> to vector<8x256xbf16>
    %c0_6 = arith.constant 0 : index
    %c0_7 = arith.constant 0 : index
    %9 = vector.load %arg4[%c0_6, %c0_7] : memref<256x256xbf16, #tpu.memory_space<vmem>>, vector<256x256xbf16>
    %cst_8 = arith.constant dense<0.000000e+00> : vector<8x256xf32>
    %10 = tpu.matmul %8, %9, %cst_8 {dimension_numbers = #tpu.dot_dimension_numbers<[1], [0], [0], [1], [0, 0, 1, 1], [], []>} : vector<8x256xbf16>, vector<256x256xbf16>, vector<8x256xf32> -> vector<8x256xf32>
    %c0_9 = arith.constant 0 : index
    %c0_10 = arith.constant 0 : index
    %11 = vector.load %arg5[%c0_9, %c0_10] : memref<1x256xf32, #tpu.memory_space<vmem>>, vector<1x256xf32>
    %12 = vector.broadcast %11 : vector<1x256xf32> to vector<8x256xf32>
    %13 = arith.addf %10, %12 : vector<8x256xf32>
    %cst_11 = arith.constant 0.000000e+00 : f32
    %14 = vector.broadcast %cst_11 : f32 to vector<8x256xf32>
    %15 = arith.maximumf %13, %14 : vector<8x256xf32>
    %c0_12 = arith.constant 0 : index
    %c0_13 = arith.constant 0 : index
    %16 = vector.load %arg6[%c0_12, %c0_13] : memref<1x256xf32, #tpu.memory_space<vmem>>, vector<1x256xf32>
    %17 = vector.broadcast %16 : vector<1x256xf32> to vector<8x256xf32>
    %18 = arith.mulf %15, %17 : vector<8x256xf32>
    %cst_14 = arith.constant dense<0.000000e+00> : vector<8xf32>
    %19 = vector.multi_reduction <add>, %18, %cst_14 [1] : vector<8x256xf32> to vector<8xf32>
    %20 = vector.shape_cast %19 : vector<8xf32> to vector<8x1xf32>
    %c0_15 = arith.constant 0 : index
    %c0_16 = arith.constant 0 : index
    %21 = vector.load %arg7[%c0_15, %c0_16] : memref<1x1xf32, #tpu.memory_space<vmem>>, vector<1x1xf32>
    %22 = vector.broadcast %21 : vector<1x1xf32> to vector<8x1xf32>
    %23 = arith.addf %20, %22 : vector<8x1xf32>
    %c0_17 = arith.constant 0 : index
    %c0_18 = arith.constant 0 : index
    %24 = vector.load %arg8[%c0_17, %c0_18] : memref<8x1xf32, #tpu.memory_space<vmem>>, vector<8x1xf32>
    tpu.vector_store %arg8[%c0_17, %c0_18], %23 {strides = array<i32>} : memref<8x1xf32, #tpu.memory_space<vmem>>, vector<8x1xf32>,
    return
  }
  func.func @transform_0(%arg0: i32) -> (i32, i32) {
    %c0_i32 = arith.constant 0 : i32
    %c0_i32_0 = arith.constant 0 : i32
    return %arg0, %c0_i32 : i32, i32
  }
  func.func @transform_1(%arg0: i32) -> (i32, i32) {
    %c0_i32 = arith.constant 0 : i32
    %c0_i32_0 = arith.constant 0 : i32
    %c0_i32_1 = arith.constant 0 : i32
    return %c0_i32, %c0_i32_0 : i32, i32
  }
  func.func @transform_2(%arg0: i32) -> (i32, i32) {
    %c0_i32 = arith.constant 0 : i32
    %c0_i32_0 = arith.constant 0 : i32
    %c0_i32_1 = arith.constant 0 : i32
    return %c0_i32, %c0_i32_0 : i32, i32
  }
  func.func @transform_3(%arg0: i32) -> (i32, i32) {
    %c0_i32 = arith.constant 0 : i32
    %c0_i32_0 = arith.constant 0 : i32
    %c0_i32_1 = arith.constant 0 : i32
    return %c0_i32, %c0_i32_0 : i32, i32
  }
  func.func @transform_4(%arg0: i32) -> (i32, i32) {
    %c0_i32 = arith.constant 0 : i32
    %c0_i32_0 = arith.constant 0 : i32
    %c0_i32_1 = arith.constant 0 : i32
    return %c0_i32, %c0_i32_0 : i32, i32
  }
  func.func @transform_5(%arg0: i32) -> (i32, i32) {
    %c0_i32 = arith.constant 0 : i32
    %c0_i32_0 = arith.constant 0 : i32
    %c0_i32_1 = arith.constant 0 : i32
    return %c0_i32, %c0_i32_0 : i32, i32
  }
  func.func @transform_6(%arg0: i32) -> (i32, i32) {
    %c0_i32 = arith.constant 0 : i32
    %c0_i32_0 = arith.constant 0 : i32
    %c0_i32_1 = arith.constant 0 : i32
    return %c0_i32, %c0_i32_0 : i32, i32
  }
  func.func @transform_7(%arg0: i32) -> (i32, i32) {
    %c0_i32 = arith.constant 0 : i32
    %c0_i32_0 = arith.constant 0 : i32
    return %arg0, %c0_i32 : i32, i32
  }
}

</mosaic_0001>

<bundles_post_ra>
// kernel: tpu_custom_call.1
= control target key start
LH: loop header
LB: loop body
LE: loop exit
PB: predicated region body
PF: predicated region fallthrough
CT: control target
= control target key end

     0   :  { %s694_s0 = inlined_call_operand.hbm [shape: bf16[8,12], index: 0, kind: input, shape index: {}]   ;;  %s695_s1 = inlined_call_operand.hbm [shape: bf16[12,256], index: 1, kind: input, shape index: {}]   ;;  %s696_s2 = inlined_call_operand.vmem [shape: f32[1,256], index: 2, kind: input, shape index: {}]   ;;  %s697_s3 = inlined_call_operand.hbm [shape: bf16[256,256], index: 3, kind: input, shape index: {}]   ;;  %s698_s4 = inlined_call_operand.vmem [shape: f32[1,256], index: 4, kind: input, shape index: {}]   ;;  %s699_s5 = inlined_call_operand.vmem [shape: f32[1,256], index: 5, kind: input, shape index: {}]   ;;  %s700_s6 = inlined_call_operand.<no memory space> [shape: f32[1,1], index: 6, kind: input, shape index: {}]   ;;  %s701_s7 = inlined_call_operand.vmem [shape: f32[8,1], index: 7, kind: output, shape index: {}]  }
   0x1   :  { %v12_v0 = vstv %s700_s6 }
   0x2   :  { %13 = vst [vmem:[#allocation2] sm:$0x1] %v12_v0 }
   0x3   :  { %14 = vsyncpa [#allocation4], 0 }
   0x4   :  { %15 = vsyncpa [#allocation6], 0  ;;  %s591_s26 = smov [#allocation5]   ;;  %s521_s30 = scalar_lea.hbm %s695_s1, 256 }
   0x5   :  { %s31_s27 = sshll.u32 %s591_s26, 4  ;;  %p522_p0 = scmp.ne.s32.totalorder %s695_s1, %s521_s30  ;;  %s32_s27 = int_to_ptr.vmem [resolvable:$true] %s31_s27 }
   0x6   :  { %p525_p1 = scmp.lt.u32.totalorder %s521_s30, %s695_s1 }
   0x8   :  { %p527_p2 = pnand %p525_p1, %p522_p0 }
   0xa   :  { %530 = shalt.err (!%p527_p2)
}
   0xb   :  { %s531_s6 = scalar_lea.vmem %s32_s27, 256  ;;  %p536_p4 = scmp.lt.s32.totalorder %s32_s27, %s32_s27 }
   0xc   :  { %p532_p3 = scmp.ne.s32.totalorder %s32_s27, %s531_s6  ;;  %p537_p5 = scmp.lt.s32.totalorder %s531_s6, %s531_s6 }
   0xe   :  { %p538_p6 = por %p537_p5, %p536_p4 }
  0x10   :  { %p539_p7 = pnand %p538_p6, %p532_p3 }
  0x12   :  { %542 = shalt.err (!%p539_p7)
}
  0x13   :  { %s592_s12 = smov 128   ;;  %s593_s13 = smov 8  }
  0x14   :  { %37 = dma.hbm_to_vmem [thread:$0]  %s695_s1, 256, %s32_s27, [#allocation6], %s592_s12, %s592_s12, %s593_s13  }
  0x15   :  { %s594_s16 = smov [#allocation3]   ;;  %s595_s18 = smov [#allocation7]  }
  0x16   :  { %s22_s17 = sshll.u32 %s594_s16, 4  ;;  %s45_s19 = sshll.u32 %s595_s18, 4  ;;  %s23_s17 = int_to_ptr.vmem [resolvable:$true] %s22_s17  ;;  %s46_s19 = int_to_ptr.vmem [resolvable:$true] %s45_s19 }
  0x17   :  { %s543_s22 = scalar_lea.hbm %s694_s0, 64 }
  0x18   :  { %p544_p8 = scmp.ne.s32.totalorder %s694_s0, %s543_s22  ;;  %p547_p9 = scmp.lt.u32.totalorder %s543_s22, %s694_s0 }
  0x1a   :  { %p549_p10 = pnand %p547_p9, %p544_p8 }
  0x1c   :  { %552 = shalt.err (!%p549_p10)
}
  0x1d   :  { %s553_s1 = scalar_lea.vmem %s23_s17, 64  ;;  %p558_p12 = scmp.lt.s32.totalorder %s23_s17, %s23_s17 }
  0x1e   :  { %p554_p11 = scmp.ne.s32.totalorder %s23_s17, %s553_s1  ;;  %p559_p13 = scmp.lt.s32.totalorder %s553_s1, %s553_s1 }
  0x20   :  { %p560_p0 = por %p559_p13, %p558_p12 }
  0x22   :  { %p561_p1 = pnand %p560_p0, %p554_p11 }
  0x24   :  { %564 = shalt.err (!%p561_p1)
}
  0x25   :  { %25 = dma.hbm_to_vmem [thread:$0]  %s694_s0, 64, %s23_s17, [#allocation4]  }
  0x26   :  { %s565_s8 = scalar_lea.hbm %s697_s3, 4096 }
  0x27   :  { %p566_p2 = scmp.ne.s32.totalorder %s697_s3, %s565_s8  ;;  %p569_p3 = scmp.lt.u32.totalorder %s565_s8, %s697_s3 }
  0x29   :  { %p571_p4 = pnand %p569_p3, %p566_p2 }
  0x2b   :  { %574 = shalt.err (!%p571_p4)
}
  0x2c   :  { %s575_s14 = scalar_lea.vmem %s46_s19, 4096  ;;  %p580_p6 = scmp.lt.s32.totalorder %s46_s19, %s46_s19 }
  0x2d   :  { %p576_p5 = scmp.ne.s32.totalorder %s46_s19, %s575_s14  ;;  %p581_p7 = scmp.lt.s32.totalorder %s575_s14, %s575_s14 }
  0x2f   :  { %p582_p8 = por %p581_p7, %p580_p6 }
  0x31   :  { %p583_p9 = pnand %p582_p8, %p576_p5 }
  0x33   :  { %586 = shalt.err (!%p583_p9)
}
  0x34   :  { %51 = dma.hbm_to_vmem [thread:$0]  %s697_s3, 4096, %s46_s19, [#allocation6], %s592_s12, %s592_s12, %s593_s13  }
  0x35   :  { %587 = dma.done.wait [#allocation4], 64  }
  0x36   :  { %588 = vsyncadd [#allocation4], 4294967232 }
  0x37   :  { %589 = dma.done.wait [#allocation6], 4352  }
  0x38   :  { %590 = vsyncadd [#allocation6], 4294962944  ;;  %v596_v1 = vmov 0   ;;  %vm95_vm0 = vcmask 1045504   ;;  %v473_v4 = vld [vmem:[#allocation7 + $0x4] ss:$8 sps:$4 sm:$0xff]   ;;  %v73_v38 = vlaneseq }
  0x39   :  { %134 = vmatprep.mubr.bf16.mxu0 %v596_v1  ;;  %v470_v2 = vld [vmem:[#allocation5 + $0x4] ss:$8 sps:$4 sm:$0x3f]   ;;  %v472_v3 = vld [vmem:[#allocation5] ss:$8 sps:$4 sm:$0x3f]   ;;  %351 = vmatprep.subr.bf16.mxu1 %v473_v4 }
  0x3a   :  { %429 = vmatprep.subr.msk.bf16.mxu0 %vm95_vm0, %v470_v2  ;;  %v475_v5 = vld [vmem:[#allocation7] ss:$8 sps:$4 sm:$0xff]   ;;  %v97_v6 = vsel %vm95_vm0, %v472_v3, 0  ;;  %v476_v7 = vld [vmem:[#allocation7 + $0x14] ss:$8 sps:$4 sm:$0xff]   ;;  %vm91_vm1 = vcmask 97280  }
  0x3b   :  { %103 = vmatpush1.bf16.msra.mxu0 %v97_v6  ;;  %v68_v8 = vld [vmem:[#allocation3] sm:$0xf]  ;;  %352 = vmatpush1.bf16.msra.mxu1 %v475_v5  ;;  %v478_v9 = vld [vmem:[#allocation7 + $0x10] ss:$8 sps:$4 sm:$0xff]   ;;  %v481_v11 = vld [vmem:[#allocation7 + $0x20] ss:$8 sps:$4 sm:$0xff]  }
  0x3c   :  { %353 = vmatprep.subr.bf16.mxu1 %v476_v7  ;;  %v479_v10 = vld [vmem:[#allocation7 + $0x24] ss:$8 sps:$4 sm:$0xff]   ;;  %v482_v12 = vld [vmem:[#allocation7 + $0x34] ss:$8 sps:$4 sm:$0xff]   ;;  %v484_v13 = vld [vmem:[#allocation7 + $0x30] ss:$8 sps:$4 sm:$0xff]  }
  0x3d   :  { %v485_v14 = vld [vmem:[#allocation7 + $0x44] ss:$8 sps:$4 sm:$0xff]   ;;  %v487_v15 = vld [vmem:[#allocation7 + $0x40] ss:$8 sps:$4 sm:$0xff]   ;;  %v488_v16 = vld [vmem:[#allocation7 + $0x54] ss:$8 sps:$4 sm:$0xff]  }
  0x3e   :  { %430 = vmatmul.mubr.msk.bf16.vlgmr.msra.gmra.mrb[0].mxu0 %vm91_vm1, %v68_v8  ;;  %v490_v17 = vld [vmem:[#allocation7 + $0x50] ss:$8 sps:$4 sm:$0xff]   ;;  %v491_v18 = vld [vmem:[#allocation7 + $0x64] ss:$8 sps:$4 sm:$0xff]   ;;  %v493_v19 = vld [vmem:[#allocation7 + $0x60] ss:$8 sps:$4 sm:$0xff]  }
  0x3f   :  { %354 = vmatpush1.bf16.msra.mxu1 %v478_v9  ;;  %v494_v20 = vld [vmem:[#allocation7 + $0x74] ss:$8 sps:$4 sm:$0xff]   ;;  %v496_v21 = vld [vmem:[#allocation7 + $0x70] ss:$8 sps:$4 sm:$0xff]   ;;  %v497_v22 = vld [vmem:[#allocation7 + $0x84] ss:$8 sps:$4 sm:$0xff]  }
  0x40   :  { %355 = vmatprep.subr.bf16.mxu1 %v479_v10  ;;  %v499_v23 = vld [vmem:[#allocation7 + $0x80] ss:$8 sps:$4 sm:$0xff]   ;;  %v500_v24 = vld [vmem:[#allocation7 + $0x94] ss:$8 sps:$4 sm:$0xff]   ;;  %v502_v25 = vld [vmem:[#allocation7 + $0x90] ss:$8 sps:$4 sm:$0xff]  }
  0x41   :  { %v503_v26 = vld [vmem:[#allocation7 + $0xa4] ss:$8 sps:$4 sm:$0xff]   ;;  %v505_v27 = vld [vmem:[#allocation7 + $0xa0] ss:$8 sps:$4 sm:$0xff]   ;;  %v506_v28 = vld [vmem:[#allocation7 + $0xb4] ss:$8 sps:$4 sm:$0xff]  }
  0x42   :  { %v508_v29 = vld [vmem:[#allocation7 + $0xb0] ss:$8 sps:$4 sm:$0xff]   ;;  %v509_v30 = vld [vmem:[#allocation7 + $0xc4] ss:$8 sps:$4 sm:$0xff]   ;;  %v511_v31 = vld [vmem:[#allocation7 + $0xc0] ss:$8 sps:$4 sm:$0xff]  }
  0x43   :  { %356 = vmatpush1.bf16.msra.mxu1 %v481_v11  ;;  %v512_v32 = vld [vmem:[#allocation7 + $0xd4] ss:$8 sps:$4 sm:$0xff]   ;;  %v514_v33 = vld [vmem:[#allocation7 + $0xd0] ss:$8 sps:$4 sm:$0xff]   ;;  %v515_v34 = vld [vmem:[#allocation7 + $0xe4] ss:$8 sps:$4 sm:$0xff]  }
  0x44   :  { %357 = vmatprep.subr.bf16.mxu1 %v482_v12  ;;  %v517_v35 = vld [vmem:[#allocation7 + $0xe0] ss:$8 sps:$4 sm:$0xff]   ;;  %v518_v36 = vld [vmem:[#allocation7 + $0xf4] ss:$8 sps:$4 sm:$0xff]   ;;  %v520_v37 = vld [vmem:[#allocation7 + $0xf0] ss:$8 sps:$4 sm:$0xff]  }
  0x45   :  { %v74_v39 = vshrl.u32 %v73_v38, 7  ;;  %v71_v41 = vld [vmem:[%s696_s2] sm:$0x3]  ;;  %vm419_vm2 = vcmask 7168  }
  0x46   :  { %v179_v55 = vld [vmem:[%s698_s4] sm:$0x3] }
  0x47   :  { %358 = vmatpush1.bf16.msra.mxu1 %v484_v13  ;;  %v75_v40 = vsub.s32 0, %v74_v39  ;;  %v79_v42 = vsub.s32 1, %v74_v39  ;;  %v394_v58 = vld [vmem:[%s699_s5] sm:$0x3] }
  0x48   :  { %359 = vmatprep.subr.bf16.mxu1 %v485_v14  ;;  %v463_v8 = vld [vmem:[#allocation2] ss:$0 sm:$0xff] }
  0x49   :  { %v76_v43 = vrot.slane %v71_v41, %v75_v40  ;;  %v80_v44 = vrot.slane %v71_v41, %v79_v42  ;;  %v184_v56 = vrot.slane %v179_v55, %v75_v40  ;;  %v188_v57 = vrot.slane %v179_v55, %v79_v42 }
  0x4a   :  { %v399_v62 = vrot.slane %v394_v58, %v75_v40  ;;  %v403_v1 = vrot.slane %v394_v58, %v79_v42 }
  0x4b   :  { %360 = vmatpush1.bf16.msra.mxu1 %v487_v15 }
  0x4c   :  { %361 = vmatprep.subr.bf16.mxu1 %v488_v16 }
  0x4f   :  { %362 = vmatpush1.bf16.msra.mxu1 %v490_v17 }
  0x50   :  { %363 = vmatprep.subr.bf16.mxu1 %v491_v18 }
  0x53   :  { %364 = vmatpush1.bf16.msra.mxu1 %v493_v19 }
  0x54   :  { %365 = vmatprep.subr.bf16.mxu1 %v494_v20 }
  0x57   :  { %366 = vmatpush1.bf16.msra.mxu1 %v496_v21 }
  0x58   :  { %367 = vmatprep.subr.bf16.mxu1 %v497_v22 }
  0x5b   :  { %368 = vmatpush1.bf16.msra.mxu1 %v499_v23 }
  0x5c   :  { %369 = vmatprep.subr.bf16.mxu1 %v500_v24 }
  0x5f   :  { %370 = vmatpush1.bf16.msra.mxu1 %v502_v25 }
  0x60   :  { %371 = vmatprep.subr.bf16.mxu1 %v503_v26 }
  0x63   :  { %372 = vmatpush1.bf16.msra.mxu1 %v505_v27 }
  0x64   :  { %373 = vmatprep.subr.bf16.mxu1 %v506_v28 }
  0x67   :  { %374 = vmatpush1.bf16.msra.mxu1 %v508_v29 }
  0x68   :  { %375 = vmatprep.subr.bf16.mxu1 %v509_v30 }
  0x6b   :  { %376 = vmatpush1.bf16.msra.mxu1 %v511_v31 }
  0x6c   :  { %377 = vmatprep.subr.bf16.mxu1 %v512_v32 }
  0x6f   :  { %378 = vmatpush1.bf16.msra.mxu1 %v514_v33 }
  0x70   :  { %379 = vmatprep.subr.bf16.mxu1 %v515_v34 }
  0x73   :  { %380 = vmatpush1.bf16.msra.mxu1 %v517_v35 }
  0x74   :  { %381 = vmatprep.subr.bf16.mxu1 %v518_v36 }
  0x77   :  { %382 = vmatpush1.bf16.msra.mxu1 %v520_v37 }
 0x111   :  { %v136_v45 = vpop.f32.mrb[0].mxu0 }
 0x112   :  { %v137_v46 = vadd.f32 %v136_v45, %v76_v43  ;;  %v138_v47 = vpop.f32.mrb[1].mxu0 }
 0x113   :  { %v139_v48 = vadd.f32 %v138_v47, %v80_v44  ;;  %v140_v49 = vpop.f32.mrb[2].mxu0 }
 0x114   :  { %v143_v50 = vmax.f32 %v137_v46, 0.0  ;;  %v141_v51 = vpop.f32.mrb[3].mxu0 }
 0x115   :  { %v144_v52 = vmax.f32 %v139_v48, 0.0 }
 0x116   :  { %v145_v54 = vpack.c.bf16 %v143_v50, %v143_v50 }
 0x117   :  { %v146_v53 = vpack.c.bf16 %v144_v52, %v144_v52 }
 0x119   :  { %383 = vmatprep.mubr.bf16.mxu1 %v146_v53 }
 0x11a   :  { %384 = vmatmul.mubr.bf16.vlgmr.msra.gmra.mrb[0].mxu1 %v145_v54 }
 0x1ed   :  { %v385_v59 = vpop.f32.mrb[0].mxu1 }
 0x1ee   :  { %v386_v60 = vadd.f32 %v385_v59, %v184_v56  ;;  %v387_v61 = vpop.f32.mrb[1].mxu1 }
 0x1ef   :  { %v388_v63 = vadd.f32 %v387_v61, %v188_v57  ;;  %v389_v0 = vpop.f32.mrb[2].mxu1 }
 0x1f0   :  { %v392_v2 = vmax.f32 %v386_v60, 0.0  ;;  %v390_v3 = vpop.f32.mrb[3].mxu1 }
 0x1f1   :  { %v393_v4 = vmax.f32 %v388_v63, 0.0 }
 0x1f2   :  { %v406_v5 = vmul.f32 %v399_v62, %v392_v2 }
 0x1f3   :  { %v407_v6 = vmul.f32 %v403_v1, %v393_v4 }
 0x1f5   :  { %v408_v7 = vadd.f32 %v407_v6, %v406_v5 }
 0x1f7   :  { %409 = vadd.xlane.f32.xlu0 %v408_v7 }
 0x284   :  { %v410_v9 = vpop.xlane.xlu0 %409 }
 0x285   :  { %v418_v10 = vadd.f32 %v463_v8, %v410_v9 }
 0x287   :  { %420 = vst.msk [vmem:[%s701_s7] sm:$0xff] %vm419_vm2, %v418_v10 }
 0x288   :  { %425 = vsyncpa [#allocation4], 1 }
 0x289   :  { %426 = vsyncpa [#allocation6], 1 }

</bundles_post_ra>
